<compile_context>
chip_gen: v7x
topology: tpu7x:2x2x1
jax: 0.10.0
libtpu: 0.0.40
codegen_flags: <defaults>
</compile_context>

<pallas_src>
import functools

import jax
import jax.numpy as jnp
from jax.experimental import pallas as pl
from jax.experimental.pallas import tpu as pltpu

_EPS = 1e-5


def _tpu_vmem_bytes():
    try:
        return int(pltpu.get_tpu_info().vmem_capacity_bytes)
    except Exception:
        return 64 * 1024 * 1024  # conservative default (v7x per-core VMEM)


_VMEM_BYTES = _tpu_vmem_bytes()
_BIG_VMEM = _VMEM_BYTES >= 96 * 1024 * 1024            # v5e / v6e (128 MiB physical)

_ROW_TILE_CAP = 256                                     # multiple of 8
_COL_TILE_CAP = 4096 if _BIG_VMEM else 2048             # multiple of 128
_TILED_VMEM_LIMIT = (64 if _BIG_VMEM else 32) * 1024 * 1024
_FUSED_MAX_F32_BYTES = (8 if _BIG_VMEM else 4) * 1024 * 1024
_FUSED_VMEM_LIMIT = (96 if _BIG_VMEM else 48) * 1024 * 1024


def _round_up(v, m):
    return ((v + m - 1) // m) * m


def _plan(dim, cap, align):
    """Return (n_tiles, tile, padded_dim).  tile is a multiple of `align` and
    <= cap (cap is a multiple of align); padded_dim = n_tiles * tile >= dim.
    Padding in the wrapper replaces any full-dim fallback, so the VMEM budget
    stays fixed regardless of shape."""
    n = pl.cdiv(dim, cap)
    tile = _round_up(pl.cdiv(dim, n), align)
    return n, tile, n * tile


def _stats_kernel(x_ref, psum_ref, psq_ref, *, n_chunks):
    # x: (tr, tc) with tc = n_chunks * 128.  Emit per-row partial sum / sum-of-squares
    # reduced to 128 lanes with pure-VPU chunked adds (no XLU, dense 128-lane stores).
    xt = x_ref[...].astype(jnp.float32)
    acc_s = xt[:, 0:128]
    acc_q = acc_s * acc_s
    for k in range(1, n_chunks):
        c = xt[:, k * 128:(k + 1) * 128]
        acc_s = acc_s + c
        acc_q = acc_q + c * c
    psum_ref[...] = acc_s
    psq_ref[...] = acc_q


def _norm_kernel(ps_ref, x_ref, o_ref):
    # ps: (tr, 2) packed [scale, shift]; x/o: (tr, tc).  One FMA per element.
    xt = x_ref[...].astype(jnp.float32)
    o_ref[...] = (xt * ps_ref[:, 0:1] + ps_ref[:, 1:2]).astype(o_ref.dtype)


@functools.partial(jax.jit, static_argnames=("eps", "force_two_pass"))
def conditional_batchnorm2d(x, y, embed_weight, eps=_EPS, force_two_pass=False):
    """x: (N, C, H, W); y: (N,) int class ids; embed_weight: (num_classes, 2*C)."""
    N, C, H, W = x.shape
    HW = H * W
    rows = N * C
    count = N * HW
    inv_count = 1.0 / float(count)

    # Conditional affine params (tiny gather; kept in the XLA wrapper).
    gb = jnp.take(embed_weight, y, axis=0).astype(jnp.float32)    # (N, 2C)
    gamma, beta = gb[:, :C], gb[:, C:]

    # Lane-dense column plan: pad HW once to a multiple of 128 (zero pad is
    # stats-safe; `count` uses the real HW).
    n_ct, tc, colsP = _plan(HW, _COL_TILE_CAP, 128)
    pad_c = colsP - HW

    use_fused = (not force_two_pass) and (rows * colsP * 4 <= _FUSED_MAX_F32_BYTES)

    if use_fused:
        # ---- Single fused pass: whole slab resident in VMEM. ----
        x3 = x.reshape(N, C, HW)
        if pad_c:
            x3 = jnp.pad(x3, ((0, 0), (0, 0), (0, pad_c)))
        gb3 = jnp.stack([gamma, beta], axis=0)[..., None]          # (2, N, C, 1)

        def fused_kernel(gb_ref, x_ref, o_ref):
            xt = x_ref[...].astype(jnp.float32)                    # (N, C, P)
            s = jnp.sum(xt, axis=2, keepdims=True)                 # (N, C, 1)
            q = jnp.sum(xt * xt, axis=2, keepdims=True)
            s = jnp.sum(s, axis=0, keepdims=True)                  # (1, C, 1)
            q = jnp.sum(q, axis=0, keepdims=True)
            mean = s * inv_count
            # TODO(synk): shifted/Welford accumulation if inputs are far from
            # zero-centered (E[x^2]-mean^2 can cancel catastrophically in f32).
            var = jnp.maximum(q * inv_count - mean * mean, 0.0)
            inv_std = jax.lax.rsqrt(var + eps)
            scale = gb_ref[0] * inv_std                            # (N, C, 1)
            shift = gb_ref[1] - mean * scale
            o_ref[...] = (xt * scale + shift).astype(o_ref.dtype)

        outP = pl.pallas_call(
            fused_kernel,
            out_shape=jax.ShapeDtypeStruct((N, C, colsP), x.dtype),
            compiler_params=pltpu.CompilerParams(
                vmem_limit_bytes=_FUSED_VMEM_LIMIT),
        )(gb3, x3)
        out = outP[:, :, :HW] if pad_c else outP
        return out.reshape(N, C, H, W)

    # ---- Two-pass tiled path (large activations). ----
    n_rt, tr, rowsP = _plan(rows, _ROW_TILE_CAP, 8)
    pad_r = rowsP - rows

    x2 = x.reshape(rows, HW)
    if pad_r or pad_c:
        x2 = jnp.pad(x2, ((0, pad_r), (0, pad_c)))

    # Pass 1 (Pallas): per-tile partials on the dense slab, fully parallel grid.
    psum, psq = pl.pallas_call(
        functools.partial(_stats_kernel, n_chunks=tc // 128),
        out_shape=(jax.ShapeDtypeStruct((rowsP, n_ct * 128), jnp.float32),
                   jax.ShapeDtypeStruct((rowsP, n_ct * 128), jnp.float32)),
        grid=(n_rt, n_ct),
        in_specs=[pl.BlockSpec((tr, tc), lambda i, j: (i, j))],
        out_specs=(pl.BlockSpec((tr, 128), lambda i, j: (i, j)),
                   pl.BlockSpec((tr, 128), lambda i, j: (i, j))),
        compiler_params=pltpu.CompilerParams(
            dimension_semantics=("parallel", "parallel"),
            vmem_limit_bytes=_TILED_VMEM_LIMIT),
    )(x2)

    # Tiny finalization (per-channel stats + per-(n,c) scale/shift fold); jit fuses
    # these few small ops and the streaming passes dominate at this input size.
    ch_sum = psum[:rows].reshape(N, C, -1).sum(axis=(0, 2))        # (C,)
    ch_sq = psq[:rows].reshape(N, C, -1).sum(axis=(0, 2))          # (C,)
    mean = ch_sum * inv_count
    # TODO(synk): shifted/Welford accumulation for non-zero-centered inputs.
    var = jnp.maximum(ch_sq * inv_count - mean * mean, 0.0)
    inv_std = jax.lax.rsqrt(var + eps)
    scale = gamma * inv_std[None, :]                               # (N, C)
    shift = beta - mean[None, :] * scale
    params = jnp.stack([scale.reshape(-1), shift.reshape(-1)], axis=1)   # (rows, 2)
    if pad_r:
        params = jnp.pad(params, ((0, pad_r), (0, 0)))

    # Pass 2 (Pallas): lane-dense FMA stream, fully parallel grid.
    outP = pl.pallas_call(
        _norm_kernel,
        out_shape=jax.ShapeDtypeStruct((rowsP, colsP), x.dtype),
        grid=(n_rt, n_ct),
        in_specs=[pl.BlockSpec((tr, 2), lambda i, j: (i, 0)),
                  pl.BlockSpec((tr, tc), lambda i, j: (i, j))],
        out_specs=pl.BlockSpec((tr, tc), lambda i, j: (i, j)),
        compiler_params=pltpu.CompilerParams(
            dimension_semantics=("parallel", "parallel"),
            vmem_limit_bytes=_TILED_VMEM_LIMIT),
    )(params, x2)

    out2 = outP[:rows, :HW] if (pad_r or pad_c) else outP
    return out2.reshape(N, C, H, W)


# ----------------------------- test harness -----------------------------

def _reference(x, y, embed_weight, eps=_EPS):
    N, C, H, W = x.shape
    mean = x.mean(axis=(0, 2, 3), keepdims=True)
    var = x.var(axis=(0, 2, 3), keepdims=True)     # biased, as BN normalization uses
    xhat = (x - mean) / jnp.sqrt(var + eps)
    gb = embed_weight[y]
    gamma = gb[:, :C].reshape(N, C, 1, 1)
    beta = gb[:, C:].reshape(N, C, 1, 1)
    return gamma * xhat + beta


def _make_inputs(key, N, C, H, W, num_classes):
    kx, ke, ky = jax.random.split(key, 3)
    x = jax.random.normal(kx, (N, C, H, W), dtype=jnp.float32)
    # PyTorch init: embed.weight[:, :C] ~ Normal(1, 0.02), embed.weight[:, C:] = 0.
    gamma_w = 1.0 + 0.02 * jax.random.normal(ke, (num_classes, C), dtype=jnp.float32)
    embed_weight = jnp.concatenate(
        [gamma_w, jnp.zeros((num_classes, C), jnp.float32)], axis=1)
    y = jax.random.randint(ky, (N,), 0, num_classes, dtype=jnp.int32)
    return x, y, embed_weight


def _check(x, y, embed_weight, force_two_pass):
    out = jax.block_until_ready(
        conditional_batchnorm2d(x, y, embed_weight, force_two_pass=force_two_pass))
    ref = _reference(x, y, embed_weight)
    assert out.shape == x.shape and out.dtype == x.dtype
    err = float(jnp.max(jnp.abs(out - ref)))
    assert jnp.allclose(out, ref, atol=1e-4, rtol=1e-4), err


if __name__ == "__main__":
    root = jax.random.PRNGKey(0)
    k0, k1, k2 = jax.random.split(root, 3)

    # Main module-sized case: exercises the single-pass fused kernel.
    x, y, w = _make_inputs(k0, 2, 4, 16, 16, 10)
    _check(x, y, w, force_two_pass=False)
    # Same inputs through the tiled two-pass path.
    _check(x, y, w, force_two_pass=True)

    # Odd spatial size (HW % 128 != 0) and odd row count -> padding paths, both kernels.
    x, y, w = _make_inputs(k1, 3, 5, 9, 11, 7)
    _check(x, y, w, force_two_pass=False)
    _check(x, y, w, force_two_pass=True)

    # Multi-tile grid on both axes of the two-pass path (rows > row tile, HW > col tile).
    x, y, w = _make_inputs(k2, 2, 160, 68, 68, 10)
    _check(x, y, w, force_two_pass=True)

    print("KERNEL_OK")
</pallas_src>

<mosaic_0001>
module attributes {stable_mosaic.version = 11 : i64} {
  func.func @fused_kernel(%arg0: memref<2x2x4x1xf32, #tpu.memory_space<vmem>>, %arg1: memref<2x4x256xf32, #tpu.memory_space<vmem>>, %arg2: memref<2x4x256xf32, #tpu.memory_space<vmem>>) attributes {dimension_semantics = [], scalar_prefetch = 0 : i64, scratch_operands = 0 : i64, tpu.core_type = #tpu.core_type<tc>} {
    %c0 = arith.constant 0 : index
    %c0_0 = arith.constant 0 : index
    %c0_1 = arith.constant 0 : index
    %0 = vector.load %arg1[%c0, %c0_0, %c0_1] : memref<2x4x256xf32, #tpu.memory_space<vmem>>, vector<2x4x256xf32>
    %cst = arith.constant dense<0.000000e+00> : vector<2x4xf32>
    %1 = vector.multi_reduction <add>, %0, %cst [2] : vector<2x4x256xf32> to vector<2x4xf32>
    %2 = vector.shape_cast %1 : vector<2x4xf32> to vector<2x4x1xf32>
    %3 = arith.mulf %0, %0 : vector<2x4x256xf32>
    %cst_2 = arith.constant dense<0.000000e+00> : vector<2x4xf32>
    %4 = vector.multi_reduction <add>, %3, %cst_2 [2] : vector<2x4x256xf32> to vector<2x4xf32>
    %5 = vector.shape_cast %4 : vector<2x4xf32> to vector<2x4x1xf32>
    %cst_3 = arith.constant dense<0.000000e+00> : vector<4x1xf32>
    %6 = vector.multi_reduction <add>, %2, %cst_3 [0] : vector<2x4x1xf32> to vector<4x1xf32>
    %7 = vector.shape_cast %6 : vector<4x1xf32> to vector<1x4x1xf32>
    %cst_4 = arith.constant dense<0.000000e+00> : vector<4x1xf32>
    %8 = vector.multi_reduction <add>, %5, %cst_4 [0] : vector<2x4x1xf32> to vector<4x1xf32>
    %9 = vector.shape_cast %8 : vector<4x1xf32> to vector<1x4x1xf32>
    %cst_5 = arith.constant 0.001953125 : f32
    %10 = vector.broadcast %cst_5 : f32 to vector<1x4x1xf32>
    %11 = arith.mulf %7, %10 : vector<1x4x1xf32>
    %cst_6 = arith.constant 0.001953125 : f32
    %12 = vector.broadcast %cst_6 : f32 to vector<1x4x1xf32>
    %13 = arith.mulf %9, %12 : vector<1x4x1xf32>
    %14 = arith.mulf %11, %11 : vector<1x4x1xf32>
    %15 = arith.subf %13, %14 : vector<1x4x1xf32>
    %cst_7 = arith.constant 0.000000e+00 : f32
    %16 = vector.broadcast %cst_7 : f32 to vector<1x4x1xf32>
    %17 = arith.maximumf %15, %16 : vector<1x4x1xf32>
    %cst_8 = arith.constant 9.99999974E-6 : f32
    %18 = vector.broadcast %cst_8 : f32 to vector<1x4x1xf32>
    %19 = arith.addf %17, %18 : vector<1x4x1xf32>
    %20 = math.rsqrt %19 : vector<1x4x1xf32>
    %c0_9 = arith.constant 0 : index
    %c0_10 = arith.constant 0 : index
    %c0_11 = arith.constant 0 : index
    %c0_12 = arith.constant 0 : index
    %21 = vector.load %arg0[%c0_9, %c0_10, %c0_11, %c0_12] : memref<2x2x4x1xf32, #tpu.memory_space<vmem>>, vector<1x2x4x1xf32>
    %22 = vector.shape_cast %21 : vector<1x2x4x1xf32> to vector<2x4x1xf32>
    %23 = vector.broadcast %20 : vector<1x4x1xf32> to vector<2x4x1xf32>
    %24 = arith.mulf %22, %23 : vector<2x4x1xf32>
    %c1 = arith.constant 1 : index
    %c0_13 = arith.constant 0 : index
    %c0_14 = arith.constant 0 : index
    %c0_15 = arith.constant 0 : index
    %25 = vector.load %arg0[%c1, %c0_13, %c0_14, %c0_15] : memref<2x2x4x1xf32, #tpu.memory_space<vmem>>, vector<1x2x4x1xf32>
    %26 = vector.shape_cast %25 : vector<1x2x4x1xf32> to vector<2x4x1xf32>
    %27 = vector.broadcast %11 : vector<1x4x1xf32> to vector<2x4x1xf32>
    %28 = arith.mulf %27, %24 : vector<2x4x1xf32>
    %29 = arith.subf %26, %28 : vector<2x4x1xf32>
    %30 = vector.broadcast %24 : vector<2x4x1xf32> to vector<2x4x256xf32>
    %31 = arith.mulf %0, %30 : vector<2x4x256xf32>
    %32 = vector.broadcast %29 : vector<2x4x1xf32> to vector<2x4x256xf32>
    %33 = arith.addf %31, %32 : vector<2x4x256xf32>
    %c0_16 = arith.constant 0 : index
    %c0_17 = arith.constant 0 : index
    %c0_18 = arith.constant 0 : index
    %34 = vector.load %arg2[%c0_16, %c0_17, %c0_18] : memref<2x4x256xf32, #tpu.memory_space<vmem>>, vector<2x4x256xf32>
    tpu.vector_store %arg2[%c0_16, %c0_17, %c0_18], %33 {strides = array<i32>} : memref<2x4x256xf32, #tpu.memory_space<vmem>>, vector<2x4x256xf32>,
    return
  }
}

</mosaic_0001>

<bundles_post_ra>
// kernel: conditional_batchnorm2d.1
= control target key start
LH: loop header
LB: loop body
LE: loop exit
PB: predicated region body
PF: predicated region fallthrough
CT: control target
= control target key end

     0   :  { %vm19_vm0 = vcmask 1043456   ;;  %v140_v20 = vmov 0   ;;  %v141_v48 = vmov 839922192   ;;  %v83_v50 = vlaneseq  ;;  %s209_s1 = inlined_call_operand.vmem [shape: f32[2,4,256], index: 1, kind: input, shape index: {}]   ;;  %s210_s0 = inlined_call_operand.vmem [shape: f32[2,2,4,1], index: 0, kind: input, shape index: {}]   ;;  %s211_s2 = inlined_call_operand.vmem [shape: f32[2,4,256], index: 2, kind: output, shape index: {}]  }
   0x1   :  { %v160_v0 = vld [vmem:[%s209_s1] sm:$0xff]  ;;  %v165_v1 = vld [vmem:[%s209_s1 + $0x8] sm:$0xff]  ;;  %135 = vset.pattern.permute.xlu1 %v140_v20  ;;  %134 = vset.pattern.permute.xlu0 %v140_v20  ;;  %v81_v49 = vunpack.c.l.s4 %v141_v48 }
   0x2   :  { %v15_v2 = vcombine.high %v160_v0, %v160_v0  ;;  %v20_v3 = vsel %vm19_vm0, %v160_v0, 0.0  ;;  %v30_v4 = vmul.f32 %v160_v0, %v160_v0  ;;  %v16_v5 = vcombine.high %v165_v1, %v165_v1  ;;  %v62_v37 = vld [vmem:[%s210_s0 + $0x4] sm:$0xf]  ;;  %v61_v38 = vld [vmem:[%s210_s0] sm:$0xf] }
   0x3   :  { %v25_v6 = vsel %vm19_vm0, %v165_v1, 0.0  ;;  %v31_v7 = vmul.f32 %v165_v1, %v165_v1  ;;  %v130_v42 = vld [vmem:[%s210_s0 + $0x8] sm:$0xf]  ;;  %v131_v46 = vld [vmem:[%s210_s0 + $0xc] sm:$0xf]  ;;  %v82_v51 = vunpack.c.0.s8 %v81_v49  ;;  %v84_v52 = vshrl.u32 %v83_v50, 7 }
   0x4   :  { %v21_v8 = vsel %vm19_vm0, %v15_v2, 0.0  ;;  %v34_v9 = vcombine.high %v30_v4, %v30_v4  ;;  %v38_v10 = vsel %vm19_vm0, %v30_v4, 0.0  ;;  %v26_v11 = vsel %vm19_vm0, %v16_v5, 0.0 }
   0x5   :  { %v22_v12 = vadd.f32 %v21_v8, %v20_v3  ;;  %v35_v13 = vcombine.high %v31_v7, %v31_v7  ;;  %v43_v15 = vsel %vm19_vm0, %v31_v7, 0.0  ;;  %v27_v17 = vadd.f32 %v26_v11, %v25_v6 }
   0x6   :  { %v39_v14 = vsel %vm19_vm0, %v34_v9, 0.0  ;;  %v85_v53 = vsub.s32 %v82_v51, %v84_v52 }
   0x7   :  { %23 = vadd.xlane.f32.xlu0 %v22_v12  ;;  %v40_v16 = vadd.f32 %v39_v14, %v38_v10  ;;  %v44_v18 = vsel %vm19_vm0, %v35_v13, 0.0 }
   0x8   :  { %v45_v19 = vadd.f32 %v44_v18, %v43_v15 }
   0x9   :  { %41 = vadd.xlane.f32.xlu1 %v40_v16 }
   0xb   :  { %28 = vadd.xlane.f32.xlu0 %v27_v17 }
   0xd   :  { %46 = vadd.xlane.f32.xlu1 %v45_v19 }
  0x94   :  { %v24_v21 = vpop.xlane.xlu0 %23 }
  0x95   :  { %v48_v24 = vsel %vm19_vm0, %v24_v21, 0.0 }
  0x96   :  { %v42_v22 = vpop.xlane.xlu1 %41 }
  0x97   :  { %v51_v28 = vsel %vm19_vm0, %v42_v22, 0.0 }
  0x98   :  { %v29_v23 = vpop.xlane.xlu0 %28 }
  0x99   :  { %v49_v25 = vsel %vm19_vm0, %v29_v23, 0.0 }
  0x9a   :  { %v50_v26 = vadd.f32 %v49_v25, %v48_v24  ;;  %v47_v27 = vpop.xlane.xlu1 %46 }
  0x9b   :  { %v52_v29 = vsel %vm19_vm0, %v47_v27, 0.0 }
  0x9c   :  { %v54_v30 = vmul.f32 0.001953125, %v50_v26  ;;  %v53_v31 = vadd.f32 %v52_v29, %v51_v28 }
  0x9e   :  { %v55_v32 = vmul.f32 0.001953125, %v53_v31  ;;  %v56_v33 = vmul.f32 %v54_v30, %v54_v30 }
  0xa0   :  { %v57_v34 = vsub.f32 %v55_v32, %v56_v33 }
  0xa2   :  { %v58_v35 = vmax.f32 %v57_v34, 0.0 }
  0xa4   :  { %v59_v36 = vadd.f32 1e-05, %v58_v35 }
  0xa6   :  { %138 = vrsqrt.f32 %v59_v36 }
  0xb0   :  { %v139_v39 = vpop.eup %138 }
  0xb1   :  { %v64_v40 = vmul.f32 %v139_v39, %v62_v37  ;;  %v63_v41 = vmul.f32 %v139_v39, %v61_v38 }
  0xb3   :  { %78 = vperm.xlu1 %135, %v64_v40   ;;  %74 = vperm.xlu0 %134, %v63_v41   ;;  %v68_v43 = vmul.f32 %v63_v41, %v54_v30  ;;  %v69_v45 = vmul.f32 %v64_v40, %v54_v30 }
  0xb5   :  { %v70_v44 = vsub.f32 %v130_v42, %v68_v43  ;;  %v71_v47 = vsub.f32 %v131_v46, %v69_v45 }
  0xb7   :  { %100 = vperm.xlu1 %135, %v70_v44  }
  0xbb   :  { %104 = vperm.xlu1 %135, %v71_v47  }
 0x132   :  { %v79_v54 = vpop.permute.xlu1 %78  ;;  %v75_v55 = vpop.permute.xlu0 %74 }
 0x133   :  { %v86_v56 = vrot.slane %v75_v55, %v85_v53  ;;  %v93_v58 = vrot.slane %v79_v54, %v85_v53 }
 0x135   :  { %v96_v59 = vmul.f32 %v86_v56, %v160_v0  ;;  %v97_v63 = vmul.f32 %v93_v58, %v165_v1 }
 0x136   :  { %v101_v57 = vpop.permute.xlu1 %100 }
 0x137   :  { %v112_v60 = vrot.slane %v101_v57, %v85_v53 }
 0x139   :  { %v122_v61 = vadd.f32 %v112_v60, %v96_v59 }
 0x13a   :  { %v105_v62 = vpop.permute.xlu1 %104 }
 0x13b   :  { %124 = vst [vmem:[%s211_s2] sm:$0xff] %v122_v61  ;;  %v119_v2 = vrot.slane %v105_v62, %v85_v53 }
 0x13d   :  { %v123_v3 = vadd.f32 %v119_v2, %v97_v63 }
 0x13f   :  { %125 = vst [vmem:[%s211_s2 + $0x8] sm:$0xff] %v123_v3 }

</bundles_post_ra>
